<compile_context>
chip_gen: v5e
topology: v5e:2x2
jax: 0.10.0
libtpu: 0.0.40
codegen_flags: <defaults>
</compile_context>

<pallas_src>
import functools

import jax
import jax.numpy as jnp
from jax.experimental import pallas as pl
from jax.experimental.pallas import tpu as pltpu

STATE_DIM = 6
ACTION_DIM = 3
HIDDEN_DIM = 256
IN_PAD = 8            # state feature dim padded to 8 lanes
OUT_PAD = 128         # packed output width: action cols 0..2, next_state cols 3..8
TM_MAX = 2048         # max batch rows per grid step
SMALL_BATCH_XLA = 256  # below this, plain XLA is lower latency than a kernel launch


def _round_up(x, m):
    return ((x + m - 1) // m) * m


def _device_kind():
    try:
        return jax.devices()[0].device_kind.lower()
    except Exception:
        return ""


def _num_tensorcores():
    # v7x has 2 TensorCores per chip; everything else we target has 1.
    return 2 if "v7" in _device_kind() else 1


def _supports_bf16_epilogue():
    # bf16 VALU exists on v6e / v7x; v5e (and older) keep the f32 epilogue.
    kind = _device_kind()
    return ("v6" in kind) or ("v7" in kind)


def _tile_plan(B):
    """Pick (tm, padded_B). Fewest steps on 1-TC chips; >=2 (even) steps on v7x."""
    b8 = _round_up(max(B, 8), 8)
    ntc = _num_tensorcores()
    n_tiles = pl.cdiv(b8, TM_MAX)
    if ntc > 1 and b8 >= 8 * ntc:
        # Even number of grid steps so the "parallel" axis shards across both TCs.
        n_tiles = _round_up(max(n_tiles, ntc), ntc)
    tm = _round_up(pl.cdiv(b8, n_tiles), 8)
    n_tiles = pl.cdiv(b8, tm)
    return tm, n_tiles * tm


# ---------------------------------------------------------------------------
# Shared forward math (used by the Pallas kernel and the small-batch XLA path).
# ---------------------------------------------------------------------------
def _forward_math(s, weights, bf16_epilogue):
    """s: [TM, 8] f32 (cols 0..5 valid).  Returns packed [TM, 128] f32."""
    (w1w, b1, w2, b2, w3, b3,
     wp1a, bp1, wp2, bp2, wp3, bp3) = weights
    bf16 = jnp.bfloat16

    def act_relu(acc_f32, bias_f32):
        # Bias + ReLU epilogue; next matmul always consumes bf16 operands.
        if bf16_epilogue:
            return jnp.maximum(acc_f32.astype(bf16) + bias_f32.astype(bf16), 0)
        return jnp.maximum(acc_f32 + bias_f32, 0.0).astype(bf16)

    # Fused K=8 first layers (policy layer-1 ++ physics layer-1 state-part),
    # kept in f32 for full input precision (K=8 -> negligible MXU cost).
    h01 = jnp.dot(s, w1w, preferred_element_type=jnp.float32)        # [TM, 512]

    # ---- policy_net ----
    h = act_relu(h01[:, :HIDDEN_DIM], b1)
    h = act_relu(jnp.dot(h, w2, preferred_element_type=jnp.float32), b2)
    act = jnp.tanh(
        jnp.dot(h, w3, preferred_element_type=jnp.float32) + b3)     # [TM, 128] f32
    # act cols 0..2 = action; cols 3..127 are exactly 0 (tanh(0) == 0).

    # ---- physics_net on cat([state, action]) ----
    hp_acc = h01[:, HIDDEN_DIM:] + jnp.dot(
        act.astype(bf16), wp1a, preferred_element_type=jnp.float32)
    hp = act_relu(hp_acc, bp1)
    hp = act_relu(jnp.dot(hp, wp2, preferred_element_type=jnp.float32), bp2)
    ns = jnp.dot(hp, wp3, preferred_element_type=jnp.float32) + bp3  # [TM, 128] f32
    # ns cols 3..8 = next_state; all other cols are exactly 0.

    # Non-overlapping nonzero lanes -> sum packs both outputs losslessly.
    return act + ns


def _pisac_kernel(s_ref,
                  w1w_ref, b1_ref,
                  w2_ref, b2_ref,
                  w3_ref, b3_ref,
                  wp1a_ref, bp1_ref,
                  wp2_ref, bp2_ref,
                  wp3_ref, bp3_ref,
                  out_ref, *, bf16_epilogue):
    weights = tuple(r[...] for r in (
        w1w_ref, b1_ref, w2_ref, b2_ref, w3_ref, b3_ref,
        wp1a_ref, bp1_ref, wp2_ref, bp2_ref, wp3_ref, bp3_ref))
    out_ref[...] = _forward_math(s_ref[...], weights, bf16_epilogue)


def _const_spec(shape):
    return pl.BlockSpec(shape, lambda i: tuple(0 for _ in shape))


@functools.partial(jax.jit, static_argnames=("force_pallas",))
def pisac_forward(state, kernel_params, force_pallas=False):
    """state: [B, 6] float32 -> (action [B, 3], next_state [B, 6])."""
    B = state.shape[0]
    weights = kernel_params  # tuple of 12 arrays in kernel layout
    use_pallas = force_pallas or (B >= SMALL_BATCH_XLA)

    if not use_pallas:
        # Small-batch path: kernel launch + pad/slice would dominate latency.
        s_pad = jnp.zeros((B, IN_PAD), jnp.float32).at[:, :STATE_DIM].set(
            state.astype(jnp.float32))
        out = _forward_math(s_pad, weights, bf16_epilogue=False)
    else:
        tm, Bp = _tile_plan(B)
        s_pad = jnp.zeros((Bp, IN_PAD), jnp.float32).at[:B, :STATE_DIM].set(
            state.astype(jnp.float32))

        in_specs = [pl.BlockSpec((tm, IN_PAD), lambda i: (i, 0))]
        in_specs += [_const_spec(w.shape) for w in weights]  # VMEM-resident, DMA'd once

        out = pl.pallas_call(
            functools.partial(_pisac_kernel,
                              bf16_epilogue=_supports_bf16_epilogue()),
            grid=(Bp // tm,),
            in_specs=in_specs,
            out_specs=pl.BlockSpec((tm, OUT_PAD), lambda i: (i, 0)),
            out_shape=jax.ShapeDtypeStruct((Bp, OUT_PAD), jnp.float32),
            compiler_params=pltpu.CompilerParams(
                dimension_semantics=("parallel",),
            ),
        )(s_pad, *weights)

    # Single contiguous slice of the packed block, then split the 9 lanes.
    packed = out[:B, :ACTION_DIM + STATE_DIM]
    return packed[:, :ACTION_DIM], packed[:, ACTION_DIM:]


# ---------------------------------------------------------------------------
# Deterministic parameter init (PyTorch-Linear-style uniform), laid out for the
# kernel: f32 fused first-layer weight, bf16 hidden/output weights, f32 biases.
# ---------------------------------------------------------------------------
def init_params(key):
    keys = jax.random.split(key, 12)

    def linear(kw, kb, fan_in, fan_out):
        bound = 1.0 / (fan_in ** 0.5)
        w = jax.random.uniform(kw, (fan_in, fan_out), jnp.float32, -bound, bound)
        b = jax.random.uniform(kb, (fan_out,), jnp.float32, -bound, bound)
        return w, b

    # policy_net: 6 -> 256 -> 256 -> 3
    w1, b1 = linear(keys[0], keys[1], STATE_DIM, HIDDEN_DIM)
    w2, b2 = linear(keys[2], keys[3], HIDDEN_DIM, HIDDEN_DIM)
    w3, b3 = linear(keys[4], keys[5], HIDDEN_DIM, ACTION_DIM)
    # physics_net: 9 -> 256 -> 256 -> 6
    wp1, bp1 = linear(keys[6], keys[7], STATE_DIM + ACTION_DIM, HIDDEN_DIM)
    wp2, bp2 = linear(keys[8], keys[9], HIDDEN_DIM, HIDDEN_DIM)
    wp3, bp3 = linear(keys[10], keys[11], HIDDEN_DIM, STATE_DIM)

    bf16 = jnp.bfloat16

    # Fused first-layer weight [8, 512]: cols 0..255 = policy W1, cols 256..511 =
    # state-part of physics W1.  Kept f32 (K=8 matmul is free, preserves input bits).
    w1w = jnp.zeros((IN_PAD, 2 * HIDDEN_DIM), jnp.float32)
    w1w = w1w.at[:STATE_DIM, :HIDDEN_DIM].set(w1)
    w1w = w1w.at[:STATE_DIM, HIDDEN_DIM:].set(wp1[:STATE_DIM])

    w3_p = jnp.zeros((HIDDEN_DIM, OUT_PAD), jnp.float32).at[:, :ACTION_DIM].set(w3).astype(bf16)
    b3_p = jnp.zeros((1, OUT_PAD), jnp.float32).at[0, :ACTION_DIM].set(b3)

    # Action-part of physics W1: rows 0..2 valid (act's lanes 3..127 are exactly 0).
    wp1a = jnp.zeros((OUT_PAD, HIDDEN_DIM), jnp.float32).at[:ACTION_DIM].set(
        wp1[STATE_DIM:]).astype(bf16)
    # next_state weights shifted to output cols 3..8 for the packed output block.
    wp3_p = jnp.zeros((HIDDEN_DIM, OUT_PAD), jnp.float32).at[
        :, ACTION_DIM:ACTION_DIM + STATE_DIM].set(wp3).astype(bf16)
    bp3_p = jnp.zeros((1, OUT_PAD), jnp.float32).at[
        0, ACTION_DIM:ACTION_DIM + STATE_DIM].set(bp3)

    kernel_params = (
        w1w, b1.reshape(1, -1),
        w2.astype(bf16), b2.reshape(1, -1),
        w3_p, b3_p,
        wp1a, bp1.reshape(1, -1),
        wp2.astype(bf16), bp2.reshape(1, -1),
        wp3_p, bp3_p,
    )
    ref_params = (w1, b1, w2, b2, w3, b3, wp1, bp1, wp2, bp2, wp3, bp3)
    return kernel_params, ref_params


def reference_forward(state, ref_params):
    """Pure-JAX f32 reference matching the PyTorch module exactly."""
    (w1, b1, w2, b2, w3, b3, wp1, bp1, wp2, bp2, wp3, bp3) = ref_params
    h = jax.nn.relu(state @ w1 + b1)
    h = jax.nn.relu(h @ w2 + b2)
    action = jnp.tanh(h @ w3 + b3)
    pin = jnp.concatenate([state, action], axis=-1)
    hp = jax.nn.relu(pin @ wp1 + bp1)
    hp = jax.nn.relu(hp @ wp2 + bp2)
    next_state = hp @ wp3 + bp3
    return action, next_state


if __name__ == "__main__":
    key = jax.random.PRNGKey(0)
    pkey, skey_small, skey_large = jax.random.split(key, 3)
    kernel_params, ref_params = init_params(pkey)

    # (B, key, force_pallas):
    #   B=8  forced  -> exercises the Pallas kernel on a single tiny tile
    #   B=8  auto    -> exercises the small-batch XLA dispatch path
    #   B=3000 auto  -> exercises the tiled Pallas grid (>=2 steps; padded rows sliced off)
    cases = ((8, skey_small, True), (8, skey_small, False), (3000, skey_large, False))
    for B, sk, force in cases:
        state = jax.random.normal(sk, (B, STATE_DIM), jnp.float32)

        action, next_state = pisac_forward(state, kernel_params, force_pallas=force)
        jax.block_until_ready((action, next_state))

        a_ref, ns_ref = reference_forward(state, ref_params)
        assert action.shape == (B, ACTION_DIM)
        assert next_state.shape == (B, STATE_DIM)
        # bf16 MXU operands vs f32 reference -> loosened tolerance.
        assert jnp.allclose(action, a_ref, atol=2e-2, rtol=2e-2), \
            f"action mismatch B={B} force={force}"
        assert jnp.allclose(next_state, ns_ref, atol=2e-2, rtol=2e-2), \
            f"next_state mismatch B={B} force={force}"

    print("KERNEL_OK")
</pallas_src>

<mosaic_0001>
module attributes {stable_mosaic.version = 11 : i64} {
  func.func @_pisac_kernel(%arg0: i32, %arg1: memref<8x8xf32, #tpu.memory_space<vmem>>, %arg2: memref<8x512xf32, #tpu.memory_space<vmem>>, %arg3: memref<1x256xf32, #tpu.memory_space<vmem>>, %arg4: memref<256x256xbf16, #tpu.memory_space<vmem>>, %arg5: memref<1x256xf32, #tpu.memory_space<vmem>>, %arg6: memref<256x128xbf16, #tpu.memory_space<vmem>>, %arg7: memref<1x128xf32, #tpu.memory_space<vmem>>, %arg8: memref<128x256xbf16, #tpu.memory_space<vmem>>, %arg9: memref<1x256xf32, #tpu.memory_space<vmem>>, %arg10: memref<256x256xbf16, #tpu.memory_space<vmem>>, %arg11: memref<1x256xf32, #tpu.memory_space<vmem>>, %arg12: memref<256x128xbf16, #tpu.memory_space<vmem>>, %arg13: memref<1x128xf32, #tpu.memory_space<vmem>>, %arg14: memref<8x128xf32, #tpu.memory_space<vmem>>) attributes {dimension_semantics = [#tpu.dimension_semantics<parallel>], iteration_bounds = array<i64: 1>, scalar_prefetch = 0 : i64, scratch_operands = 0 : i64, tpu.core_type = #tpu.core_type<tc>, window_params = [{transform_indices = @transform_0, window_bounds = array<i64: 8, 8>}, {pipeline_mode = #tpu.pipeline_mode<synchronous>, transform_indices = @transform_1, window_bounds = array<i64: 8, 512>}, {pipeline_mode = #tpu.pipeline_mode<synchronous>, transform_indices = @transform_2, window_bounds = array<i64: 1, 256>}, {pipeline_mode = #tpu.pipeline_mode<synchronous>, transform_indices = @transform_3, window_bounds = array<i64: 256, 256>}, {pipeline_mode = #tpu.pipeline_mode<synchronous>, transform_indices = @transform_4, window_bounds = array<i64: 1, 256>}, {pipeline_mode = #tpu.pipeline_mode<synchronous>, transform_indices = @transform_5, window_bounds = array<i64: 256, 128>}, {pipeline_mode = #tpu.pipeline_mode<synchronous>, transform_indices = @transform_6, window_bounds = array<i64: 1, 128>}, {pipeline_mode = #tpu.pipeline_mode<synchronous>, transform_indices = @transform_7, window_bounds = array<i64: 128, 256>}, {pipeline_mode = #tpu.pipeline_mode<synchronous>, transform_indices = @transform_8, window_bounds = array<i64: 1, 256>}, {pipeline_mode = #tpu.pipeline_mode<synchronous>, transform_indices = @transform_9, window_bounds = array<i64: 256, 256>}, {pipeline_mode = #tpu.pipeline_mode<synchronous>, transform_indices = @transform_10, window_bounds = array<i64: 1, 256>}, {pipeline_mode = #tpu.pipeline_mode<synchronous>, transform_indices = @transform_11, window_bounds = array<i64: 256, 128>}, {pipeline_mode = #tpu.pipeline_mode<synchronous>, transform_indices = @transform_12, window_bounds = array<i64: 1, 128>}, {transform_indices = @transform_13, window_bounds = array<i64: 8, 128>}]} {
    %c0 = arith.constant 0 : index
    %c0_0 = arith.constant 0 : index
    %0 = vector.load %arg2[%c0, %c0_0] : memref<8x512xf32, #tpu.memory_space<vmem>>, vector<8x512xf32>
    %c0_1 = arith.constant 0 : index
    %c0_2 = arith.constant 0 : index
    %1 = vector.load %arg3[%c0_1, %c0_2] : memref<1x256xf32, #tpu.memory_space<vmem>>, vector<1x256xf32>
    %c0_3 = arith.constant 0 : index
    %c0_4 = arith.constant 0 : index
    %2 = vector.load %arg4[%c0_3, %c0_4] : memref<256x256xbf16, #tpu.memory_space<vmem>>, vector<256x256xbf16>
    %c0_5 = arith.constant 0 : index
    %c0_6 = arith.constant 0 : index
    %3 = vector.load %arg5[%c0_5, %c0_6] : memref<1x256xf32, #tpu.memory_space<vmem>>, vector<1x256xf32>
    %c0_7 = arith.constant 0 : index
    %c0_8 = arith.constant 0 : index
    %4 = vector.load %arg6[%c0_7, %c0_8] : memref<256x128xbf16, #tpu.memory_space<vmem>>, vector<256x128xbf16>
    %c0_9 = arith.constant 0 : index
    %c0_10 = arith.constant 0 : index
    %5 = vector.load %arg7[%c0_9, %c0_10] : memref<1x128xf32, #tpu.memory_space<vmem>>, vector<1x128xf32>
    %c0_11 = arith.constant 0 : index
    %c0_12 = arith.constant 0 : index
    %6 = vector.load %arg8[%c0_11, %c0_12] : memref<128x256xbf16, #tpu.memory_space<vmem>>, vector<128x256xbf16>
    %c0_13 = arith.constant 0 : index
    %c0_14 = arith.constant 0 : index
    %7 = vector.load %arg9[%c0_13, %c0_14] : memref<1x256xf32, #tpu.memory_space<vmem>>, vector<1x256xf32>
    %c0_15 = arith.constant 0 : index
    %c0_16 = arith.constant 0 : index
    %8 = vector.load %arg10[%c0_15, %c0_16] : memref<256x256xbf16, #tpu.memory_space<vmem>>, vector<256x256xbf16>
    %c0_17 = arith.constant 0 : index
    %c0_18 = arith.constant 0 : index
    %9 = vector.load %arg11[%c0_17, %c0_18] : memref<1x256xf32, #tpu.memory_space<vmem>>, vector<1x256xf32>
    %c0_19 = arith.constant 0 : index
    %c0_20 = arith.constant 0 : index
    %10 = vector.load %arg12[%c0_19, %c0_20] : memref<256x128xbf16, #tpu.memory_space<vmem>>, vector<256x128xbf16>
    %c0_21 = arith.constant 0 : index
    %c0_22 = arith.constant 0 : index
    %11 = vector.load %arg13[%c0_21, %c0_22] : memref<1x128xf32, #tpu.memory_space<vmem>>, vector<1x128xf32>
    %c0_23 = arith.constant 0 : index
    %c0_24 = arith.constant 0 : index
    %12 = vector.load %arg1[%c0_23, %c0_24] : memref<8x8xf32, #tpu.memory_space<vmem>>, vector<8x8xf32>
    %cst = arith.constant dense<0.000000e+00> : vector<8x512xf32>
    %13 = tpu.matmul %12, %0, %cst {dimension_numbers = #tpu.dot_dimension_numbers<[1], [0], [0], [1], [0, 0, 1, 1], [], []>} : vector<8x8xf32>, vector<8x512xf32>, vector<8x512xf32> -> vector<8x512xf32>
    %14 = vector.extract_strided_slice %13 {offsets = [0, 0], sizes = [8, 256], strides = [1, 1]} : vector<8x512xf32> to vector<8x256xf32>
    %15 = vector.broadcast %1 : vector<1x256xf32> to vector<8x256xf32>
    %16 = arith.addf %14, %15 : vector<8x256xf32>
    %cst_25 = arith.constant 0.000000e+00 : f32
    %17 = vector.broadcast %cst_25 : f32 to vector<8x256xf32>
    %18 = arith.maximumf %16, %17 : vector<8x256xf32>
    %19 = arith.truncf %18 : vector<8x256xf32> to vector<8x256xbf16>
    %cst_26 = arith.constant dense<0.000000e+00> : vector<8x256xf32>
    %20 = tpu.matmul %19, %2, %cst_26 {dimension_numbers = #tpu.dot_dimension_numbers<[1], [0], [0], [1], [0, 0, 1, 1], [], []>} : vector<8x256xbf16>, vector<256x256xbf16>, vector<8x256xf32> -> vector<8x256xf32>
    %21 = vector.broadcast %3 : vector<1x256xf32> to vector<8x256xf32>
    %22 = arith.addf %20, %21 : vector<8x256xf32>
    %cst_27 = arith.constant 0.000000e+00 : f32
    %23 = vector.broadcast %cst_27 : f32 to vector<8x256xf32>
    %24 = arith.maximumf %22, %23 : vector<8x256xf32>
    %25 = arith.truncf %24 : vector<8x256xf32> to vector<8x256xbf16>
    %cst_28 = arith.constant dense<0.000000e+00> : vector<8x128xf32>
    %26 = tpu.matmul %25, %4, %cst_28 {dimension_numbers = #tpu.dot_dimension_numbers<[1], [0], [0], [1], [0, 0, 1, 1], [], []>} : vector<8x256xbf16>, vector<256x128xbf16>, vector<8x128xf32> -> vector<8x128xf32>
    %27 = vector.broadcast %5 : vector<1x128xf32> to vector<8x128xf32>
    %28 = arith.addf %26, %27 : vector<8x128xf32>
    %29 = math.tanh %28 : vector<8x128xf32>
    %30 = vector.extract_strided_slice %13 {offsets = [0, 256], sizes = [8, 256], strides = [1, 1]} : vector<8x512xf32> to vector<8x256xf32>
    %31 = arith.truncf %29 : vector<8x128xf32> to vector<8x128xbf16>
    %cst_29 = arith.constant dense<0.000000e+00> : vector<8x256xf32>
    %32 = tpu.matmul %31, %6, %cst_29 {dimension_numbers = #tpu.dot_dimension_numbers<[1], [0], [0], [1], [0, 0, 1, 1], [], []>} : vector<8x128xbf16>, vector<128x256xbf16>, vector<8x256xf32> -> vector<8x256xf32>
    %33 = arith.addf %30, %32 : vector<8x256xf32>
    %34 = vector.broadcast %7 : vector<1x256xf32> to vector<8x256xf32>
    %35 = arith.addf %33, %34 : vector<8x256xf32>
    %cst_30 = arith.constant 0.000000e+00 : f32
    %36 = vector.broadcast %cst_30 : f32 to vector<8x256xf32>
    %37 = arith.maximumf %35, %36 : vector<8x256xf32>
    %38 = arith.truncf %37 : vector<8x256xf32> to vector<8x256xbf16>
    %cst_31 = arith.constant dense<0.000000e+00> : vector<8x256xf32>
    %39 = tpu.matmul %38, %8, %cst_31 {dimension_numbers = #tpu.dot_dimension_numbers<[1], [0], [0], [1], [0, 0, 1, 1], [], []>} : vector<8x256xbf16>, vector<256x256xbf16>, vector<8x256xf32> -> vector<8x256xf32>
    %40 = vector.broadcast %9 : vector<1x256xf32> to vector<8x256xf32>
    %41 = arith.addf %39, %40 : vector<8x256xf32>
    %cst_32 = arith.constant 0.000000e+00 : f32
    %42 = vector.broadcast %cst_32 : f32 to vector<8x256xf32>
    %43 = arith.maximumf %41, %42 : vector<8x256xf32>
    %44 = arith.truncf %43 : vector<8x256xf32> to vector<8x256xbf16>
    %cst_33 = arith.constant dense<0.000000e+00> : vector<8x128xf32>
    %45 = tpu.matmul %44, %10, %cst_33 {dimension_numbers = #tpu.dot_dimension_numbers<[1], [0], [0], [1], [0, 0, 1, 1], [], []>} : vector<8x256xbf16>, vector<256x128xbf16>, vector<8x128xf32> -> vector<8x128xf32>
    %46 = vector.broadcast %11 : vector<1x128xf32> to vector<8x128xf32>
    %47 = arith.addf %45, %46 : vector<8x128xf32>
    %48 = arith.addf %29, %47 : vector<8x128xf32>
    %c0_34 = arith.constant 0 : index
    %c0_35 = arith.constant 0 : index
    %49 = vector.load %arg14[%c0_34, %c0_35] : memref<8x128xf32, #tpu.memory_space<vmem>>, vector<8x128xf32>
    tpu.vector_store %arg14[%c0_34, %c0_35], %48 {strides = array<i32>} : memref<8x128xf32, #tpu.memory_space<vmem>>, vector<8x128xf32>,
    return
  }
  func.func @transform_0(%arg0: i32) -> (i32, i32) {
    %c0_i32 = arith.constant 0 : i32
    %c0_i32_0 = arith.constant 0 : i32
    return %arg0, %c0_i32 : i32, i32
  }
  func.func @transform_1(%arg0: i32) -> (i32, i32) {
    %c0_i32 = arith.constant 0 : i32
    %c0_i32_0 = arith.constant 0 : i32
    %c0_i32_1 = arith.constant 0 : i32
    return %c0_i32, %c0_i32_0 : i32, i32
  }
  func.func @transform_2(%arg0: i32) -> (i32, i32) {
    %c0_i32 = arith.constant 0 : i32
    %c0_i32_0 = arith.constant 0 : i32
    %c0_i32_1 = arith.constant 0 : i32
    return %c0_i32, %c0_i32_0 : i32, i32
  }
  func.func @transform_3(%arg0: i32) -> (i32, i32) {
    %c0_i32 = arith.constant 0 : i32
    %c0_i32_0 = arith.constant 0 : i32
    %c0_i32_1 = arith.constant 0 : i32
    return %c0_i32, %c0_i32_0 : i32, i32
  }
  func.func @transform_4(%arg0: i32) -> (i32, i32) {
    %c0_i32 = arith.constant 0 : i32
    %c0_i32_0 = arith.constant 0 : i32
    %c0_i32_1 = arith.constant 0 : i32
    return %c0_i32, %c0_i32_0 : i32, i32
  }
  func.func @transform_5(%arg0: i32) -> (i32, i32) {
    %c0_i32 = arith.constant 0 : i32
    %c0_i32_0 = arith.constant 0 : i32
    %c0_i32_1 = arith.constant 0 : i32
    return %c0_i32, %c0_i32_0 : i32, i32
  }
  func.func @transform_6(%arg0: i32) -> (i32, i32) {
    %c0_i32 = arith.constant 0 : i32
    %c0_i32_0 = arith.constant 0 : i32
    %c0_i32_1 = arith.constant 0 : i32
    return %c0_i32, %c0_i32_0 : i32, i32
  }
  func.func @transform_7(%arg0: i32) -> (i32, i32) {
    %c0_i32 = arith.constant 0 : i32
    %c0_i32_0 = arith.constant 0 : i32
    %c0_i32_1 = arith.constant 0 : i32
    return %c0_i32, %c0_i32_0 : i32, i32
  }
  func.func @transform_8(%arg0: i32) -> (i32, i32) {
    %c0_i32 = arith.constant 0 : i32
    %c0_i32_0 = arith.constant 0 : i32
    %c0_i32_1 = arith.constant 0 : i32
    return %c0_i32, %c0_i32_0 : i32, i32
  }
  func.func @transform_9(%arg0: i32) -> (i32, i32) {
    %c0_i32 = arith.constant 0 : i32
    %c0_i32_0 = arith.constant 0 : i32
    %c0_i32_1 = arith.constant 0 : i32
    return %c0_i32, %c0_i32_0 : i32, i32
  }
  func.func @transform_10(%arg0: i32) -> (i32, i32) {
    %c0_i32 = arith.constant 0 : i32
    %c0_i32_0 = arith.constant 0 : i32
    %c0_i32_1 = arith.constant 0 : i32
    return %c0_i32, %c0_i32_0 : i32, i32
  }
  func.func @transform_11(%arg0: i32) -> (i32, i32) {
    %c0_i32 = arith.constant 0 : i32
    %c0_i32_0 = arith.constant 0 : i32
    %c0_i32_1 = arith.constant 0 : i32
    return %c0_i32, %c0_i32_0 : i32, i32
  }
  func.func @transform_12(%arg0: i32) -> (i32, i32) {
    %c0_i32 = arith.constant 0 : i32
    %c0_i32_0 = arith.constant 0 : i32
    %c0_i32_1 = arith.constant 0 : i32
    return %c0_i32, %c0_i32_0 : i32, i32
  }
  func.func @transform_13(%arg0: i32) -> (i32, i32) {
    %c0_i32 = arith.constant 0 : i32
    %c0_i32_0 = arith.constant 0 : i32
    return %arg0, %c0_i32 : i32, i32
  }
}

</mosaic_0001>

<bundles_post_ra>
// kernel: pisac_forward.1
= control target key start
LH: loop header
LB: loop body
LE: loop exit
PB: predicated region body
PF: predicated region fallthrough
CT: control target
= control target key end

     0   :  { %18 = vsyncpa [#allocation3], 0  ;;  %s2091_s0 = inlined_call_operand.vmem [shape: f32[8,8], index: 0, kind: input, shape index: {}]   ;;  %s2092_s1 = inlined_call_operand.vmem [shape: f32[8,512], index: 1, kind: input, shape index: {}]   ;;  %s2093_s2 = inlined_call_operand.vmem [shape: f32[1,256], index: 2, kind: input, shape index: {}]   ;;  %s2094_s3 = inlined_call_operand.hbm [shape: bf16[256,256], index: 3, kind: input, shape index: {}]   ;;  %s2095_s4 = inlined_call_operand.vmem [shape: f32[1,256], index: 4, kind: input, shape index: {}]   ;;  %s2096_s5 = inlined_call_operand.hbm [shape: bf16[256,128], index: 5, kind: input, shape index: {}]   ;;  %s2097_s6 = inlined_call_operand.hbm [shape: f32[1,128], index: 6, kind: input, shape index: {}]   ;;  %s2098_s7 = inlined_call_operand.hbm [shape: bf16[128,256], index: 7, kind: input, shape index: {}]   ;;  %s2099_s8 = inlined_call_operand.vmem [shape: f32[1,256], index: 8, kind: input, shape index: {}]   ;;  %s2100_s9 = inlined_call_operand.hbm [shape: bf16[256,256], index: 9, kind: input, shape index: {}]   ;;  %s2101_s10 = inlined_call_operand.vmem [shape: f32[1,256], index: 10, kind: input, shape index: {}]   ;;  %s2102_s11 = inlined_call_operand.hbm [shape: bf16[256,128], index: 11, kind: input, shape index: {}]   ;;  %s2103_s12 = inlined_call_operand.vmem [shape: f32[1,128], index: 12, kind: input, shape index: {}]   ;;  %s2104_s13 = inlined_call_operand.vmem [shape: f32[8,128], index: 13, kind: output, shape index: {}]  }
   0x1   :  { %19 = vsyncpa [#allocation5], 0 }
   0x2   :  { %20 = vsyncpa [#allocation8], 0  ;;  %s47_s27 = sshll.u32 %s2096_s5, 4  ;;  %s48_s27 = int_to_ptr.hbm [resolvable:$true] %s47_s27 }
   0x3   :  { %21 = vsyncpa [#allocation11], 0  ;;  %s1939_s28 = smov [#allocation4]   ;;  %s1940_s30 = smov 64  }
   0x4   :  { %s49_s29 = sshll.u32 %s1939_s28, 4  ;;  %s1941_s14 = smov 4   ;;  %s50_s29 = int_to_ptr.vmem [resolvable:$true] %s49_s29 }
   0x5   :  { %55 = dma.hbm_to_vmem [thread:$0]  %s48_s27, 2048, %s50_s29, [#allocation5], %s1940_s30, %s1940_s30, %s1941_s14  }
   0x6   :  { %s71_s17 = sshll.u32 %s2098_s7, 4  ;;  %s1942_s18 = smov [#allocation7]   ;;  %s72_s17 = int_to_ptr.hbm [resolvable:$true] %s71_s17 }
   0x7   :  { %s73_s19 = sshll.u32 %s1942_s18, 4  ;;  %s32_s21 = sshll.u32 %s2094_s3, 4  ;;  %s74_s19 = int_to_ptr.vmem [resolvable:$true] %s73_s19  ;;  %s33_s21 = int_to_ptr.hbm [resolvable:$true] %s32_s21 }
   0x8   :  { %s1943_s22 = smov 128   ;;  %s1944_s23 = smov 8  }
   0x9   :  { %79 = dma.hbm_to_vmem [thread:$0]  %s72_s17, 2048, %s74_s19, [#allocation8], %s1943_s22, %s1943_s22, %s1944_s23  }
   0xa   :  { %s61_s26 = sshll.u32 %s2097_s6, 4  ;;  %s1945_s27 = smov [#allocation2]   ;;  %s62_s26 = int_to_ptr.hbm [resolvable:$true] %s61_s26 }
   0xb   :  { %s34_s28 = sshll.u32 %s1945_s27, 4  ;;  %s1946_s7 = smov [#allocation6]   ;;  %s35_s28 = int_to_ptr.vmem [resolvable:$true] %s34_s28 }
   0xc   :  { %40 = dma.hbm_to_vmem [thread:$0]  %s33_s21, 4096, %s35_s28, [#allocation3], %s1943_s22, %s1943_s22, %s1944_s23  }
   0xd   :  { %s63_s29 = sshll.u32 %s1946_s7, 4  ;;  %s86_s3 = sshll.u32 %s2100_s9, 4  ;;  %s64_s29 = int_to_ptr.vmem [resolvable:$true] %s63_s29  ;;  %s87_s3 = int_to_ptr.hbm [resolvable:$true] %s86_s3 }
   0xe   :  { %66 = dma.hbm_to_vmem [thread:$0]  %s62_s26, 16, %s64_s29, [#allocation5]  }
   0xf   :  { %s101_s19 = sshll.u32 %s2102_s11, 4  ;;  %s1947_s20 = smov [#allocation9]   ;;  %s102_s19 = int_to_ptr.hbm [resolvable:$true] %s101_s19 }
  0x10   :  { %s88_s6 = sshll.u32 %s1947_s20, 4  ;;  %s1948_s5 = smov [#allocation10]   ;;  %s89_s6 = int_to_ptr.vmem [resolvable:$true] %s88_s6 }
  0x11   :  { %94 = dma.hbm_to_vmem [thread:$0]  %s87_s3, 4096, %s89_s6, [#allocation8], %s1943_s22, %s1943_s22, %s1944_s23  }
  0x12   :  { %s103_s21 = sshll.u32 %s1948_s5, 4  ;;  %s104_s21 = int_to_ptr.vmem [resolvable:$true] %s103_s21 }
  0x13   :  { %109 = dma.hbm_to_vmem [thread:$0]  %s102_s19, 2048, %s104_s21, [#allocation11], %s1940_s30, %s1940_s30, %s1941_s14  }
  0x14   :  { %1931 = dma.done.wait [#allocation3], 4096  }
  0x15   :  { %1932 = vsyncadd [#allocation3], 4294963200 }
  0x16   :  { %1933 = dma.done.wait [#allocation5], 2064  }
  0x17   :  { %1934 = vsyncadd [#allocation5], 4294965232 }
  0x18   :  { %1935 = dma.done.wait [#allocation8], 6144  }
  0x19   :  { %1936 = vsyncadd [#allocation8], 4294961152 }
  0x1a   :  { %1937 = dma.done.wait [#allocation11], 2048  }
  0x1b   :  { %1938 = vsyncadd [#allocation11], 4294965248  ;;  %vm291_vm0 = vcmask 64512   ;;  %v136_v0 = vld [vmem:[%s2092_s1] sm:$0xff]  ;;  %v137_v1 = vld [vmem:[%s2092_s1 + $0x8] sm:$0xff] }
  0x1c   :  { %v290_v2 = vld [vmem:[%s2091_s0] sm:$0xff]  ;;  %310 = vmatpush.msra.mxu2 %v136_v0  ;;  %330 = vmatpush.msra.mxu3 %v137_v1  ;;  %v138_v3 = vld [vmem:[%s2092_s1 + $0x10] sm:$0xff]  ;;  %v139_v4 = vld [vmem:[%s2092_s1 + $0x18] sm:$0xff] }
  0x1d   :  { %v1271_v5 = vld [vmem:[#allocation2 + $0x70] sm:$0xf]  ;;  %1209 = vmatmul.msk.f32.vlgmr.msra.gmra.mxu2 %vm291_vm0, %v290_v2  ;;  %1210 = vmatmul.msk.f32.vlgmr.msra.gmra.mxu3 %vm291_vm0, %v290_v2  ;;  %v1676_v6 = vld [vmem:[#allocation2 + $0x74] sm:$0xf0]  ;;  %v1675_v11 = vld [vmem:[#allocation2 + $0x74] sm:$0xf] }
  0x1e   :  { %v1335_v7 = vld [vmem:[#allocation2 + $0xf0] sm:$0xf]  ;;  %v1692_v8 = vld [vmem:[#allocation2 + $0xf4] sm:$0xf0]  ;;  %350 = vmatpush.msrb.mxu2 %v138_v3  ;;  %370 = vmatpush.msrb.mxu3 %v139_v4  ;;  %v1272_v9 = vor.u32 %v1676_v6, %v1271_v5  ;;  %v1273_v12 = vld [vmem:[#allocation2 + $0x78] sm:$0xf0] }
  0x1f   :  { %v1336_v10 = vor.u32 %v1692_v8, %v1335_v7  ;;  %v1691_v13 = vld [vmem:[#allocation2 + $0xf4] sm:$0xf]  ;;  %v1276_v14 = vor.u32 %v1675_v11, %v1273_v12  ;;  %v1337_v15 = vld [vmem:[#allocation2 + $0xf8] sm:$0xf0]  ;;  %v1263_v16 = vld [vmem:[#allocation2 + $0x60] sm:$0xf] }
  0x20   :  { %v1674_v17 = vld [vmem:[#allocation2 + $0x64] sm:$0xf0]  ;;  %551 = vmatpush.bf16.msra.mxu0 %v1272_v9  ;;  %v1340_v18 = vor.u32 %v1691_v13, %v1337_v15  ;;  %v1327_v20 = vld [vmem:[#allocation2 + $0xe0] sm:$0xf]  ;;  %v1673_v22 = vld [vmem:[#allocation2 + $0x64] sm:$0xf] }
  0x21   :  { %564 = vmatpush.bf16.msra.mxu1 %v1336_v10  ;;  %v1264_v19 = vor.u32 %v1674_v17, %v1263_v16  ;;  %v1690_v21 = vld [vmem:[#allocation2 + $0xe4] sm:$0xf0]  ;;  %577 = vmatpush.bf16.msra.mxu2 %v1276_v14  ;;  %v1265_v24 = vld [vmem:[#allocation2 + $0x68] sm:$0xf0]  ;;  %v1689_v25 = vld [vmem:[#allocation2 + $0xe4] sm:$0xf] }
  0x22   :  { %v1328_v23 = vor.u32 %v1690_v21, %v1327_v20  ;;  %v1329_v26 = vld [vmem:[#allocation2 + $0xe8] sm:$0xf0]  ;;  %590 = vmatpush.bf16.msra.mxu3 %v1340_v18  ;;  %v1268_v27 = vor.u32 %v1673_v22, %v1265_v24  ;;  %v1255_v29 = vld [vmem:[#allocation2 + $0x50] sm:$0xf]  ;;  %v1672_v30 = vld [vmem:[#allocation2 + $0x54] sm:$0xf0] }
  0x23   :  { %v1332_v28 = vor.u32 %v1689_v25, %v1329_v26  ;;  %v1319_v31 = vld [vmem:[#allocation2 + $0xd0] sm:$0xf]  ;;  %v1688_v32 = vld [vmem:[#allocation2 + $0xd4] sm:$0xf0]  ;;  %v1671_v33 = vld [vmem:[#allocation2 + $0x54] sm:$0xf]  ;;  %v1256_v35 = vor.u32 %v1672_v30, %v1255_v29 }
  0x24   :  { %v1257_v34 = vld [vmem:[#allocation2 + $0x58] sm:$0xf0]  ;;  %552 = vmatpush.bf16.msra.mxu0 %v1264_v19  ;;  %v1320_v36 = vor.u32 %v1688_v32, %v1319_v31  ;;  %v1687_v37 = vld [vmem:[#allocation2 + $0xd4] sm:$0xf]  ;;  %v1247_v39 = vld [vmem:[#allocation2 + $0x40] sm:$0xf] }
  0x25   :  { %565 = vmatpush.bf16.msra.mxu1 %v1328_v23  ;;  %v1321_v38 = vld [vmem:[#allocation2 + $0xd8] sm:$0xf0]  ;;  %578 = vmatpush.bf16.msra.mxu2 %v1268_v27  ;;  %v1260_v40 = vor.u32 %v1671_v33, %v1257_v34  ;;  %v1670_v41 = vld [vmem:[#allocation2 + $0x44] sm:$0xf0]  ;;  %v1311_v42 = vld [vmem:[#allocation2 + $0xc0] sm:$0xf] }
  0x26   :  { %v1686_v43 = vld [vmem:[#allocation2 + $0xc4] sm:$0xf0]  ;;  %1212 = vmatmul.msk.f32.vlgmr.msrb.gmra.mxu3 %vm291_vm0, %v290_v2  ;;  %v1324_v44 = vor.u32 %v1687_v37, %v1321_v38  ;;  %v1669_v45 = vld [vmem:[#allocation2 + $0x44] sm:$0xf]  ;;  %v1249_v46 = vld [vmem:[#allocation2 + $0x48] sm:$0xf0]  ;;  %1211 = vmatmul.msk.f32.vlgmr.msrb.gmra.mxu2 %vm291_vm0, %v290_v2  ;;  %v1248_v49 = vor.u32 %v1670_v41, %v1247_v39 }
  0x27   :  { %591 = vmatpush.bf16.msra.mxu3 %v1332_v28  ;;  %v1685_v47 = vld [vmem:[#allocation2 + $0xc4] sm:$0xf]  ;;  %v1313_v48 = vld [vmem:[#allocation2 + $0xc8] sm:$0xf0]  ;;  %v1312_v50 = vor.u32 %v1686_v43, %v1311_v42  ;;  %v1239_v51 = vld [vmem:[#allocation2 + $0x30] sm:$0xf]  ;;  %v1252_v52 = vor.u32 %v1669_v45, %v1249_v46 }
  0x28   :  { %553 = vmatpush.bf16.msra.mxu0 %v1256_v35  ;;  %v1668_v53 = vld [vmem:[#allocation2 + $0x34] sm:$0xf0]  ;;  %v1303_v54 = vld [vmem:[#allocation2 + $0xb0] sm:$0xf]  ;;  %v1316_v56 = vor.u32 %v1685_v47, %v1313_v48  ;;  %v1667_v57 = vld [vmem:[#allocation2 + $0x34] sm:$0xf] }
  0x29   :  { %566 = vmatpush.bf16.msra.mxu1 %v1320_v36  ;;  %579 = vmatpush.bf16.msra.mxu2 %v1260_v40  ;;  %v1684_v55 = vld [vmem:[#allocation2 + $0xb4] sm:$0xf0]  ;;  %v1241_v58 = vld [vmem:[#allocation2 + $0x38] sm:$0xf0]  ;;  %v1683_v59 = vld [vmem:[#allocation2 + $0xb4] sm:$0xf]  ;;  %v1240_v61 = vor.u32 %v1668_v53, %v1239_v51 }
  0x2a   :  { %v1305_v60 = vld [vmem:[#allocation2 + $0xb8] sm:$0xf0]  ;;  %v1304_v62 = vor.u32 %v1684_v55, %v1303_v54  ;;  %v1231_v63 = vld [vmem:[#allocation2 + $0x20] sm:$0xf]  ;;  %v1666_v0 = vld [vmem:[#allocation2 + $0x24] sm:$0xf0]  ;;  %v1244_v2 = vor.u32 %v1667_v57, %v1241_v58 }
  0x2b   :  { %592 = vmatpush.bf16.msra.mxu3 %v1324_v44  ;;  %v1295_v1 = vld [vmem:[#allocation2 + $0xa0] sm:$0xf]  ;;  %v1682_v3 = vld [vmem:[#allocation2 + $0xa4] sm:$0xf0]  ;;  %v1308_v4 = vor.u32 %v1683_v59, %v1305_v60  ;;  %v1665_v5 = vld [vmem:[#allocation2 + $0x24] sm:$0xf]  ;;  %v1232_v9 = vor.u32 %v1666_v0, %v1231_v63 }
  0x2c   :  { %554 = vmatpush.bf16.msra.mxu0 %v1248_v49  ;;  %v1233_v6 = vld [vmem:[#allocation2 + $0x28] sm:$0xf0]  ;;  %v1681_v7 = vld [vmem:[#allocation2 + $0xa4] sm:$0xf]  ;;  %v1296_v10 = vor.u32 %v1682_v3, %v1295_v1  ;;  %v1223_v13 = vld [vmem:[#allocation2 + $0x10] sm:$0xf] }
  0x2d   :  { %567 = vmatpush.bf16.msra.mxu1 %v1312_v50  ;;  %580 = vmatpush.bf16.msra.mxu2 %v1252_v52  ;;  %v1297_v8 = vld [vmem:[#allocation2 + $0xa8] sm:$0xf0]  ;;  %v1236_v11 = vor.u32 %v1665_v5, %v1233_v6  ;;  %v1664_v14 = vld [vmem:[#allocation2 + $0x14] sm:$0xf0]  ;;  %v1287_v15 = vld [vmem:[#allocation2 + $0x90] sm:$0xf] }
  0x2e   :  { %v1300_v12 = vor.u32 %v1681_v7, %v1297_v8  ;;  %v1224_v16 = vor.u32 %v1664_v14, %v1223_v13  ;;  %v1680_v17 = vld [vmem:[#allocation2 + $0x94] sm:$0xf0]  ;;  %v1663_v18 = vld [vmem:[#allocation2 + $0x14] sm:$0xf]  ;;  %v1225_v19 = vld [vmem:[#allocation2 + $0x18] sm:$0xf0] }
  0x2f   :  { %593 = vmatpush.bf16.msra.mxu3 %v1316_v56  ;;  %v1288_v20 = vor.u32 %v1680_v17, %v1287_v15  ;;  %v1228_v21 = vor.u32 %v1663_v18, %v1225_v19  ;;  %v1679_v22 = vld [vmem:[#allocation2 + $0x94] sm:$0xf]  ;;  %v1289_v23 = vld [vmem:[#allocation2 + $0x98] sm:$0xf0]  ;;  %v1215_v25 = vld [vmem:[#allocation2] sm:$0xf] }
  0x30   :  { %555 = vmatpush.bf16.msra.mxu0 %v1240_v61  ;;  %v1292_v24 = vor.u32 %v1679_v22, %v1289_v23  ;;  %v1662_v26 = vld [vmem:[#allocation2 + $0x4] sm:$0xf0]  ;;  %v1279_v27 = vld [vmem:[#allocation2 + $0x80] sm:$0xf]  ;;  %v1661_v30 = vld [vmem:[#allocation2 + $0x4] sm:$0xf] }
  0x31   :  { %568 = vmatpush.bf16.msra.mxu1 %v1304_v62  ;;  %581 = vmatpush.bf16.msra.mxu2 %v1244_v2  ;;  %v1216_v28 = vor.u32 %v1662_v26, %v1215_v25  ;;  %v1678_v29 = vld [vmem:[#allocation2 + $0x84] sm:$0xf0]  ;;  %v1217_v31 = vld [vmem:[#allocation2 + $0x8] sm:$0xf0]  ;;  %v1677_v34 = vld [vmem:[#allocation2 + $0x84] sm:$0xf] }
  0x32   :  { %v1280_v32 = vor.u32 %v1678_v29, %v1279_v27  ;;  %v1220_v33 = vor.u32 %v1661_v30, %v1217_v31  ;;  %v1281_v35 = vld [vmem:[#allocation2 + $0x88] sm:$0xf0]  ;;  %v1700_v37 = vld [vmem:[#allocation4 + $0x38] sm:$0xff]  ;;  %v1699_v39 = vld [vmem:[#allocation4 + $0x30] sm:$0xff] }
  0x33   :  { %594 = vmatpush.bf16.msra.mxu3 %v1308_v4  ;;  %v1284_v36 = vor.u32 %v1677_v34, %v1281_v35  ;;  %v1708_v38 = vld [vmem:[#allocation4 + $0x78] sm:$0xff]  ;;  %v1707_v40 = vld [vmem:[#allocation4 + $0x70] sm:$0xff]  ;;  %v1698_v41 = vld [vmem:[#allocation4 + $0x28] sm:$0xff] }
  0x34   :  { %556 = vmatpush.bf16.msra.mxu0 %v1232_v9  ;;  %v1706_v42 = vld [vmem:[#allocation4 + $0x68] sm:$0xff]  ;;  %v1697_v43 = vld [vmem:[#allocation4 + $0x20] sm:$0xff]  ;;  %v1696_v45 = vld [vmem:[#allocation4 + $0x18] sm:$0xff] }
  0x35   :  { %569 = vmatpush.bf16.msra.mxu1 %v1296_v10  ;;  %582 = vmatpush.bf16.msra.mxu2 %v1236_v11  ;;  %v1705_v44 = vld [vmem:[#allocation4 + $0x60] sm:$0xff]  ;;  %v1695_v47 = vld [vmem:[#allocation4 + $0x10] sm:$0xff]  ;;  %v1704_v58 = vld [vmem:[#allocation4 + $0x58] sm:$0xff] }
  0x36   :  { %v140_v46 = vld [vmem:[%s2093_s2] sm:$0x3]  ;;  %v1694_v59 = vld [vmem:[#allocation4 + $0x8] sm:$0xff]  ;;  %v1703_v60 = vld [vmem:[#allocation4 + $0x50] sm:$0xff] }
  0x37   :  { %595 = vmatpush.bf16.msra.mxu3 %v1300_v12  ;;  %v376_v48 = vperm.slane %v140_v46, 0  ;;  %v377_v49 = vperm.slane %v140_v46, 1  ;;  %v1693_v61 = vld [vmem:[#allocation4] sm:$0xff]  ;;  %v1702_v62 = vld [vmem:[#allocation4 + $0x48] sm:$0xff]  ;;  %v1463_v0 = vld [vmem:[#allocation7 + $0x70] sm:$0xf] }
  0x38   :  { %557 = vmatpush.bf16.msra.mxu0 %v1224_v16  ;;  %v1701_v63 = vld [vmem:[#allocation4 + $0x40] sm:$0xff]  ;;  %v1724_v1 = vld [vmem:[#allocation7 + $0x74] sm:$0xf0]  ;;  %v1723_v2 = vld [vmem:[#allocation7 + $0x74] sm:$0xf] }
  0x39   :  { %570 = vmatpush.bf16.msra.mxu1 %v1288_v20  ;;  %583 = vmatpush.bf16.msra.mxu2 %v1228_v21  ;;  %v1464_v3 = vor.u32 %v1724_v1, %v1463_v0  ;;  %v1465_v4 = vld [vmem:[#allocation7 + $0x78] sm:$0xf0]  ;;  %v1455_v5 = vld [vmem:[#allocation7 + $0x60] sm:$0xf]  ;;  %v1722_v6 = vld [vmem:[#allocation7 + $0x64] sm:$0xf0] }
  0x3a   :  { %v1468_v7 = vor.u32 %v1723_v2, %v1465_v4  ;;  %v1721_v8 = vld [vmem:[#allocation7 + $0x64] sm:$0xf]  ;;  %v1457_v9 = vld [vmem:[#allocation7 + $0x68] sm:$0xf0]  ;;  %v1456_v10 = vor.u32 %v1722_v6, %v1455_v5  ;;  %v1447_v12 = vld [vmem:[#allocation7 + $0x50] sm:$0xf] }
  0x3b   :  { %596 = vmatpush.bf16.msra.mxu3 %v1292_v24  ;;  %v1460_v11 = vor.u32 %v1721_v8, %v1457_v9  ;;  %v1720_v13 = vld [vmem:[#allocation7 + $0x54] sm:$0xf0]  ;;  %v1719_v14 = vld [vmem:[#allocation7 + $0x54] sm:$0xf]  ;;  %v1449_v15 = vld [vmem:[#allocation7 + $0x58] sm:$0xf0] }
  0x3c   :  { %558 = vmatpush.bf16.msra.mxu0 %v1216_v28  ;;  %v1448_v16 = vor.u32 %v1720_v13, %v1447_v12  ;;  %v1452_v17 = vor.u32 %v1719_v14, %v1449_v15  ;;  %v1439_v18 = vld [vmem:[#allocation7 + $0x40] sm:$0xf]  ;;  %v1718_v19 = vld [vmem:[#allocation7 + $0x44] sm:$0xf0]  ;;  %v1717_v20 = vld [vmem:[#allocation7 + $0x44] sm:$0xf] }
  0x3d   :  { %571 = vmatpush.bf16.msra.mxu1 %v1280_v32  ;;  %584 = vmatpush.bf16.msra.mxu2 %v1220_v33  ;;  %v1441_v21 = vld [vmem:[#allocation7 + $0x48] sm:$0xf0]  ;;  %v173_v22 = vld [vmem:[%s2095_s4] sm:$0x3]  ;;  %v1440_v23 = vor.u32 %v1718_v19, %v1439_v18  ;;  %v1716_v46 = vld [vmem:[#allocation7 + $0x34] sm:$0xf0] }
  0x3e   :  { %v1444_v24 = vor.u32 %v1717_v20, %v1441_v21  ;;  %v387_v27 = vperm.slane %v173_v22, 0  ;;  %v388_v32 = vperm.slane %v173_v22, 1  ;;  %v1710_v0 = vld [vmem:[#allocation7 + $0x4] sm:$0xf0]  ;;  %v1709_v1 = vld [vmem:[#allocation7 + $0x4] sm:$0xf] }
  0x3f   :  { %597 = vmatpush.bf16.msra.mxu3 %v1284_v36  ;;  %v1527_v5 = vld [vmem:[#allocation9 + $0x70] sm:$0xf]  ;;  %v1740_v6 = vld [vmem:[#allocation9 + $0x74] sm:$0xf0]  ;;  %v1755_v14 = vld [vmem:[#allocation9 + $0xf4] sm:$0xf] }
  0x40   :  { %706 = vmatpush.bf16.msrb.mxu0 %v1700_v37  ;;  %v1528_v8 = vor.u32 %v1740_v6, %v1527_v5  ;;  %v1756_v9 = vld [vmem:[#allocation9 + $0xf4] sm:$0xf0]  ;;  %v1593_v15 = vld [vmem:[#allocation9 + $0xf8] sm:$0xf0]  ;;  %v1738_v18 = vld [vmem:[#allocation9 + $0x64] sm:$0xf0] }
  0x41   :  { %719 = vmatpush.bf16.msrb.mxu1 %v1708_v38  ;;  %814 = vmatpush.bf16.msrb.mxu2 %v1464_v3  ;;  %v1409_v3 = vld [vmem:[#allocation7 + $0x8] sm:$0xf0]  ;;  %v1583_v19 = vld [vmem:[#allocation9 + $0xe0] sm:$0xf]  ;;  %v1754_v20 = vld [vmem:[#allocation9 + $0xe4] sm:$0xf0] }
  0x42   :  { %v1412_v4 = vor.u32 %v1709_v1, %v1409_v3  ;;  %v1584_v22 = vor.u32 %v1754_v20, %v1583_v19  ;;  %v1730_v5 = vld [vmem:[#allocation9 + $0x24] sm:$0xf0]  ;;  %v1551_v6 = vld [vmem:[#allocation9 + $0xa0] sm:$0xf] }
  0x43   :  { %827 = vmatpush.bf16.msrb.mxu3 %v1468_v7  ;;  %v1591_v7 = vld [vmem:[#allocation9 + $0xf0] sm:$0xf] }
  0x44   :  { %707 = vmatpush.bf16.msrb.mxu0 %v1699_v39  ;;  %v1592_v12 = vor.u32 %v1756_v9, %v1591_v7  ;;  %v1729_v9 = vld [vmem:[#allocation9 + $0x24] sm:$0xf] }
  0x45   :  { %720 = vmatpush.bf16.msrb.mxu1 %v1707_v40  ;;  %815 = vmatpush.bf16.msrb.mxu2 %v1456_v10  ;;  %v1739_v10 = vld [vmem:[#allocation9 + $0x74] sm:$0xf] }
  0x47   :  { %828 = vmatpush.bf16.msrb.mxu3 %v1460_v11  ;;  %v1529_v11 = vld [vmem:[#allocation9 + $0x78] sm:$0xf0] }
  0x48   :  { %708 = vmatpush.bf16.msrb.mxu0 %v1698_v41  ;;  %v1532_v13 = vor.u32 %v1739_v10, %v1529_v11  ;;  %v1489_v10 = vld [vmem:[#allocation9 + $0x28] sm:$0xf0]  ;;  %v1745_v11 = vld [vmem:[#allocation9 + $0xa4] sm:$0xf] }
  0x49   :  { %721 = vmatpush.bf16.msrb.mxu1 %v1706_v42  ;;  %816 = vmatpush.bf16.msrb.mxu2 %v1448_v16  ;;  %v1519_v16 = vld [vmem:[#allocation9 + $0x60] sm:$0xf] }
  0x4a   :  { %v1520_v21 = vor.u32 %v1738_v18, %v1519_v16 }
  0x4b   :  { %829 = vmatpush.bf16.msrb.mxu3 %v1452_v17  ;;  %v1596_v17 = vor.u32 %v1755_v14, %v1593_v15 }
  0x4c   :  { %709 = vmatpush.bf16.msrb.mxu0 %v1697_v43 }
  0x4d   :  { %722 = vmatpush.bf16.msrb.mxu1 %v1705_v44  ;;  %817 = vmatpush.bf16.msrb.mxu2 %v1440_v23  ;;  %v1737_v23 = vld [vmem:[#allocation9 + $0x64] sm:$0xf] }
  0x4f   :  { %830 = vmatpush.bf16.msrb.mxu3 %v1444_v24  ;;  %v1521_v24 = vld [vmem:[#allocation9 + $0x68] sm:$0xf0] }
  0x50   :  { %710 = vmatpush.bf16.msrb.mxu0 %v1696_v45  ;;  %v1431_v45 = vld [vmem:[#allocation7 + $0x30] sm:$0xf] }
  0x51   :  { %723 = vmatpush.bf16.msrb.mxu1 %v1704_v58  ;;  %v1712_v58 = vld [vmem:[#allocation7 + $0x14] sm:$0xf0] }
  0x54   :  { %711 = vmatpush.bf16.msrb.mxu0 %v1695_v47  ;;  %v1715_v47 = vld [vmem:[#allocation7 + $0x34] sm:$0xf] }
  0x55   :  { %724 = vmatpush.bf16.msrb.mxu1 %v1703_v60 }
  0x58   :  { %712 = vmatpush.bf16.msrb.mxu0 %v1694_v59  ;;  %v1711_v59 = vld [vmem:[#allocation7 + $0x14] sm:$0xf] }
  0x59   :  { %725 = vmatpush.bf16.msrb.mxu1 %v1702_v62 }
  0x5c   :  { %713 = vmatpush.bf16.msrb.mxu0 %v1693_v61  ;;  %v1417_v61 = vld [vmem:[#allocation7 + $0x18] sm:$0xf0] }
  0x5d   :  { %726 = vmatpush.bf16.msrb.mxu1 %v1701_v63  ;;  %v1420_v62 = vor.u32 %v1711_v59, %v1417_v61  ;;  %v1407_v63 = vld [vmem:[#allocation7] sm:$0xf]  ;;  %v1748_v59 = vld [vmem:[#allocation9 + $0xb4] sm:$0xf0]  ;;  %v1497_v61 = vld [vmem:[#allocation9 + $0x38] sm:$0xf0] }
  0x5e   :  { %v1408_v2 = vor.u32 %v1710_v0, %v1407_v63  ;;  %v1561_v63 = vld [vmem:[#allocation9 + $0xb8] sm:$0xf0] }
  0x5f   :  { %v1783_v0 = vld [vmem:[#allocation6] ss:$0 sm:$0xff] }
  0xa0   :  { %v312_v50 = vpop.f32.mrf.mxu2  ;;  %v332_v51 = vpop.f32.mrf.mxu3 }
  0xa1   :  { %v380_v52 = vadd.f32 %v376_v48, %v312_v50  ;;  %v381_v53 = vadd.f32 %v377_v49, %v332_v51  ;;  %v1432_v48 = vor.u32 %v1716_v46, %v1431_v45  ;;  %v1433_v49 = vld [vmem:[#allocation7 + $0x38] sm:$0xf0]  ;;  %v1423_v51 = vld [vmem:[#allocation7 + $0x20] sm:$0xf]  ;;  %v1750_v46 = vld [vmem:[#allocation9 + $0xc4] sm:$0xf0] }
  0xa2   :  { %v1436_v50 = vor.u32 %v1715_v47, %v1433_v49  ;;  %v1733_v47 = vld [vmem:[#allocation9 + $0x44] sm:$0xf] }
  0xa3   :  { %v382_v54 = vmax.f32 %v380_v52, 0.0  ;;  %v383_v55 = vmax.f32 %v381_v53, 0.0  ;;  %818 = vmatpush.bf16.msrb.mxu2 %v1432_v48  ;;  %v1714_v52 = vld [vmem:[#allocation7 + $0x24] sm:$0xf0]  ;;  %v1713_v53 = vld [vmem:[#allocation7 + $0x24] sm:$0xf] }
  0xa4   :  { %831 = vmatpush.bf16.msrb.mxu3 %v1436_v50  ;;  %v1505_v48 = vld [vmem:[#allocation9 + $0x48] sm:$0xf0]  ;;  %v1749_v49 = vld [vmem:[#allocation9 + $0xc4] sm:$0xf] }
  0xa5   :  { %v384_v56 = vpack.c.bf16 %v382_v54, %v382_v54  ;;  %v385_v57 = vpack.c.bf16 %v383_v55, %v383_v55  ;;  %v1424_v54 = vor.u32 %v1714_v52, %v1423_v51  ;;  %v1425_v55 = vld [vmem:[#allocation7 + $0x28] sm:$0xf0] }
  0xa6   :  { %v1569_v50 = vld [vmem:[#allocation9 + $0xc8] sm:$0xf0] }
  0xa7   :  { %559 = vmatmul.bf16.vlgmr.msra.gmra.mxu0 %v384_v56  ;;  %572 = vmatmul.bf16.vlgmr.msra.gmra.mxu1 %v385_v57 }
  0xa8   :  { %585 = vmatmul.bf16.vlgmr.msra.gmra.mxu2 %v384_v56  ;;  %598 = vmatmul.bf16.vlgmr.msra.gmra.mxu3 %v385_v57  ;;  %v1428_v56 = vor.u32 %v1713_v53, %v1425_v55  ;;  %v1415_v57 = vld [vmem:[#allocation7 + $0x10] sm:$0xf]  ;;  %v1508_v53 = vor.u32 %v1733_v47, %v1505_v48  ;;  %v1732_v55 = vld [vmem:[#allocation9 + $0x34] sm:$0xf0]  ;;  %v1741_v47 = vld [vmem:[#allocation9 + $0x84] sm:$0xf] }
  0xa9   :  { %v2068_v25 = vpop.f32.mrf.mxu2  ;;  %v2070_v26 = vpop.f32.mrf.mxu3  ;;  %819 = vmatpush.bf16.msrb.mxu2 %v1424_v54  ;;  %v1416_v60 = vor.u32 %v1712_v58, %v1415_v57  ;;  %1018 = vmatpush.bf16.msra.mxu0 %v1528_v8  ;;  %v1495_v54 = vld [vmem:[#allocation9 + $0x30] sm:$0xf]  ;;  %v1572_v58 = vor.u32 %v1749_v49, %v1569_v50  ;;  %v1746_v8 = vld [vmem:[#allocation9 + $0xa4] sm:$0xf0]  ;;  %v1537_v48 = vld [vmem:[#allocation9 + $0x88] sm:$0xf0] }
  0xaa   :  { %832 = vmatpush.bf16.msrb.mxu3 %v1428_v56  ;;  %1031 = vmatpush.bf16.msra.mxu1 %v1592_v12  ;;  %v1559_v56 = vld [vmem:[#allocation9 + $0xb0] sm:$0xf]  ;;  %v1496_v1 = vor.u32 %v1732_v55, %v1495_v54  ;;  %v1553_v12 = vld [vmem:[#allocation9 + $0xa8] sm:$0xf0]  ;;  %v1552_v16 = vor.u32 %v1746_v8, %v1551_v6  ;;  %v1540_v49 = vor.u32 %v1741_v47, %v1537_v48  ;;  %v1764_v50 = vld [vmem:[#allocation10 + $0x38] sm:$0xff] }
  0xab   :  { %v1556_v20 = vor.u32 %v1745_v11, %v1553_v12  ;;  %v1762_v54 = vld [vmem:[#allocation10 + $0x28] sm:$0xff]  ;;  %v1768_v11 = vld [vmem:[#allocation10 + $0x58] sm:$0xff] }
  0xac   :  { %v1770_v55 = vld [vmem:[#allocation10 + $0x68] sm:$0xff] }
  0xad   :  { %820 = vmatpush.bf16.msrb.mxu2 %v1416_v60  ;;  %1019 = vmatpush.bf16.msra.mxu0 %v1520_v21  ;;  %v1731_v60 = vld [vmem:[#allocation9 + $0x34] sm:$0xf]  ;;  %v1758_v12 = vld [vmem:[#allocation10 + $0x8] sm:$0xff] }
  0xae   :  { %833 = vmatpush.bf16.msrb.mxu3 %v1420_v62  ;;  %1032 = vmatpush.bf16.msra.mxu1 %v1584_v22  ;;  %v1747_v62 = vld [vmem:[#allocation9 + $0xb4] sm:$0xf]  ;;  %v1500_v3 = vor.u32 %v1731_v60, %v1497_v61 }
  0xaf   :  { %v1564_v7 = vor.u32 %v1747_v62, %v1561_v63  ;;  %v1759_v60 = vld [vmem:[#allocation10 + $0x10] sm:$0xff] }
  0xb1   :  { %821 = vmatpush.bf16.msrb.mxu2 %v1408_v2  ;;  %v1560_v2 = vor.u32 %v1748_v59, %v1559_v56  ;;  %v1761_v56 = vld [vmem:[#allocation10 + $0x20] sm:$0xff]  ;;  %v223_v59 = vld [vmem:[%s2099_s8] sm:$0x3] }
  0xb2   :  { %834 = vmatpush.bf16.msrb.mxu3 %v1412_v4  ;;  %v1487_v4 = vld [vmem:[#allocation9 + $0x20] sm:$0xf]  ;;  %v843_v61 = vperm.slane %v223_v59, 0  ;;  %v844_v62 = vperm.slane %v223_v59, 1 }
  0xb3   :  { %v1488_v14 = vor.u32 %v1730_v5, %v1487_v4 }
  0xb5   :  { %1044 = vmatpush.bf16.msra.mxu2 %v1532_v13 }
  0xb6   :  { %1057 = vmatpush.bf16.msra.mxu3 %v1596_v17  ;;  %v1492_v17 = vor.u32 %v1729_v9, %v1489_v10 }
 0x124   :  { %v560_v28 = vpop.f32.mrf.mxu0  ;;  %v573_v29 = vpop.f32.mrf.mxu1 }
 0x125   :  { %v561_v30 = vadd.f32 %v560_v28, %v387_v27  ;;  %v1753_v27 = vld [vmem:[#allocation9 + $0xe4] sm:$0xf]  ;;  %v1524_v28 = vor.u32 %v1737_v23, %v1521_v24  ;;  %v1479_v24 = vld [vmem:[#allocation9 + $0x10] sm:$0xf] }
 0x127   :  { %v574_v31 = vadd.f32 %v573_v29, %v561_v30  ;;  %v1585_v29 = vld [vmem:[#allocation9 + $0xe8] sm:$0xf0]  ;;  %v1511_v30 = vld [vmem:[#allocation9 + $0x50] sm:$0xf]  ;;  %1045 = vmatpush.bf16.msra.mxu2 %v1524_v28 }
 0x128   :  { %v1543_v28 = vld [vmem:[#allocation9 + $0x90] sm:$0xf] }
 0x129   :  { %v603_v33 = vmax.f32 %v574_v31, 0.0  ;;  %v1736_v31 = vld [vmem:[#allocation9 + $0x54] sm:$0xf0] }
 0x12b   :  { %v605_v34 = vpack.c.bf16 %v603_v33, %v603_v33  ;;  %v586_v35 = vpop.f32.mrf.mxu2  ;;  %v599_v36 = vpop.f32.mrf.mxu3  ;;  %v1575_v33 = vld [vmem:[#allocation9 + $0xd0] sm:$0xf] }
 0x12c   :  { %v587_v37 = vadd.f32 %v586_v35, %v388_v32  ;;  %v562_v38 = vpop.f32.mrf.mxu0  ;;  %v575_v39 = vpop.f32.mrf.mxu1  ;;  %v1588_v32 = vor.u32 %v1753_v27, %v1585_v29  ;;  %v1735_v35 = vld [vmem:[#allocation9 + $0x54] sm:$0xf]  ;;  %v1728_v27 = vld [vmem:[#allocation9 + $0x14] sm:$0xf0] }
 0x12d   :  { %714 = vmatmul.bf16.vlgmr.msrb.gmra.mxu0 %v605_v34  ;;  %v1752_v34 = vld [vmem:[#allocation9 + $0xd4] sm:$0xf0]  ;;  %v1751_v38 = vld [vmem:[#allocation9 + $0xd4] sm:$0xf]  ;;  %v1577_v39 = vld [vmem:[#allocation9 + $0xd8] sm:$0xf0]  ;;  %v1480_v29 = vor.u32 %v1728_v27, %v1479_v24 }
 0x12e   :  { %v600_v40 = vadd.f32 %v599_v36, %v587_v37  ;;  %v1512_v36 = vor.u32 %v1736_v31, %v1511_v30  ;;  %v1513_v37 = vld [vmem:[#allocation9 + $0x58] sm:$0xf0]  ;;  %1058 = vmatpush.bf16.msra.mxu3 %v1588_v32  ;;  %v1580_v45 = vor.u32 %v1751_v38, %v1577_v39  ;;  %v1744_v30 = vld [vmem:[#allocation9 + $0x94] sm:$0xf0]  ;;  %v1727_v31 = vld [vmem:[#allocation9 + $0x14] sm:$0xf] }
 0x12f   :  { %v1481_v32 = vld [vmem:[#allocation9 + $0x18] sm:$0xf0]  ;;  %v1471_v38 = vld [vmem:[#allocation9] sm:$0xf]  ;;  %v1726_v39 = vld [vmem:[#allocation9 + $0x4] sm:$0xf0] }
 0x130   :  { %v604_v41 = vmax.f32 %v600_v40, 0.0  ;;  %v1576_v40 = vor.u32 %v1752_v34, %v1575_v33  ;;  %1020 = vmatpush.bf16.msra.mxu0 %v1512_v36  ;;  %v1544_v33 = vor.u32 %v1744_v30, %v1543_v28  ;;  %v1484_v34 = vor.u32 %v1727_v31, %v1481_v32  ;;  %v1545_v36 = vld [vmem:[#allocation9 + $0x98] sm:$0xf0] }
 0x132   :  { %v606_v42 = vpack.c.bf16 %v604_v41, %v604_v41  ;;  %v1516_v41 = vor.u32 %v1735_v35, %v1513_v37  ;;  %1033 = vmatpush.bf16.msra.mxu1 %v1576_v40  ;;  %1059 = vmatpush.bf16.msra.mxu3 %v1580_v45  ;;  %v1743_v35 = vld [vmem:[#allocation9 + $0x94] sm:$0xf]  ;;  %v1535_v40 = vld [vmem:[#allocation9 + $0x80] sm:$0xf] }
 0x133   :  { %v588_v43 = vpop.f32.mrf.mxu2  ;;  %v601_v44 = vpop.f32.mrf.mxu3  ;;  %v1548_v37 = vor.u32 %v1743_v35, %v1545_v36 }
 0x134   :  { %727 = vmatmul.bf16.vlgmr.msrb.gmra.mxu1 %v606_v42  ;;  %v1503_v42 = vld [vmem:[#allocation9 + $0x40] sm:$0xf]  ;;  %v1734_v43 = vld [vmem:[#allocation9 + $0x44] sm:$0xf0]  ;;  %1046 = vmatpush.bf16.msra.mxu2 %v1516_v41  ;;  %v1472_v41 = vor.u32 %v1726_v39, %v1471_v38  ;;  %v1784_v38 = vld [vmem:[%s2103_s12] ss:$0 sm:$0xff] }
 0x135   :  { %v1567_v44 = vld [vmem:[#allocation9 + $0xc0] sm:$0xf]  ;;  %v1504_v51 = vor.u32 %v1734_v43, %v1503_v42  ;;  %v1742_v42 = vld [vmem:[#allocation9 + $0x84] sm:$0xf0]  ;;  %v1725_v43 = vld [vmem:[#allocation9 + $0x4] sm:$0xf] }
 0x136   :  { %v1568_v52 = vor.u32 %v1750_v46, %v1567_v44  ;;  %1060 = vmatpush.bf16.msra.mxu3 %v1572_v58  ;;  %v1473_v44 = vld [vmem:[#allocation9 + $0x8] sm:$0xf0]  ;;  %v1536_v45 = vor.u32 %v1742_v42, %v1535_v40  ;;  %v1760_v58 = vld [vmem:[#allocation10 + $0x18] sm:$0xff] }
 0x137   :  { %1021 = vmatpush.bf16.msra.mxu0 %v1504_v51  ;;  %v1476_v46 = vor.u32 %v1725_v43, %v1473_v44  ;;  %v1772_v51 = vld [vmem:[#allocation10 + $0x78] sm:$0xff] }
 0x138   :  { %1034 = vmatpush.bf16.msra.mxu1 %v1568_v52  ;;  %1047 = vmatpush.bf16.msra.mxu2 %v1508_v53  ;;  %v1763_v52 = vld [vmem:[#allocation10 + $0x30] sm:$0xff] }
 0x139   :  { %v1771_v53 = vld [vmem:[#allocation10 + $0x70] sm:$0xff] }
 0x13a   :  { %1061 = vmatpush.bf16.msra.mxu3 %v1564_v7 }
 0x13b   :  { %1022 = vmatpush.bf16.msra.mxu0 %v1496_v1 }
 0x13c   :  { %1035 = vmatpush.bf16.msra.mxu1 %v1560_v2  ;;  %1048 = vmatpush.bf16.msra.mxu2 %v1500_v3 }
 0x13e   :  { %1062 = vmatpush.bf16.msra.mxu3 %v1556_v20 }
 0x13f   :  { %1023 = vmatpush.bf16.msra.mxu0 %v1488_v14  ;;  %v1765_v14 = vld [vmem:[#allocation10 + $0x40] sm:$0xff] }
 0x140   :  { %1036 = vmatpush.bf16.msra.mxu1 %v1552_v16  ;;  %1049 = vmatpush.bf16.msra.mxu2 %v1492_v17 }
 0x142   :  { %1063 = vmatpush.bf16.msra.mxu3 %v1548_v37 }
 0x143   :  { %1024 = vmatpush.bf16.msra.mxu0 %v1480_v29 }
 0x144   :  { %1037 = vmatpush.bf16.msra.mxu1 %v1544_v33  ;;  %1050 = vmatpush.bf16.msra.mxu2 %v1484_v34 }
 0x146   :  { %1064 = vmatpush.bf16.msra.mxu3 %v1540_v49 }
 0x147   :  { %1025 = vmatpush.bf16.msra.mxu0 %v1472_v41 }
 0x148   :  { %1038 = vmatpush.bf16.msra.mxu1 %v1536_v45  ;;  %1051 = vmatpush.bf16.msra.mxu2 %v1476_v46 }
 0x14b   :  { %1173 = vmatpush.bf16.msrb.mxu0 %v1764_v50 }
 0x14c   :  { %1186 = vmatpush.bf16.msrb.mxu1 %v1772_v51 }
 0x14f   :  { %1174 = vmatpush.bf16.msrb.mxu0 %v1763_v52 }
 0x150   :  { %1187 = vmatpush.bf16.msrb.mxu1 %v1771_v53 }
 0x153   :  { %1175 = vmatpush.bf16.msrb.mxu0 %v1762_v54 }
 0x154   :  { %1188 = vmatpush.bf16.msrb.mxu1 %v1770_v55 }
 0x157   :  { %1176 = vmatpush.bf16.msrb.mxu0 %v1761_v56 }
 0x15b   :  { %1177 = vmatpush.bf16.msrb.mxu0 %v1760_v58 }
 0x15f   :  { %1178 = vmatpush.bf16.msrb.mxu0 %v1759_v60 }
 0x163   :  { %1179 = vmatpush.bf16.msrb.mxu0 %v1758_v12 }
 0x1aa   :  { %v715_v57 = vpop.f32.mrf.mxu0 }
 0x1ab   :  { %v716_v13 = vadd.f32 %v1783_v0, %v715_v57  ;;  %v1769_v57 = vld [vmem:[#allocation10 + $0x60] sm:$0xff] }
 0x1ac   :  { %1189 = vmatpush.bf16.msrb.mxu1 %v1769_v57 }
 0x1b0   :  { %1190 = vmatpush.bf16.msrb.mxu1 %v1768_v11 }
 0x1b1   :  { %v728_v15 = vpop.f32.mrf.mxu1 }
 0x1b2   :  { %v729_v18 = vadd.f32 %v728_v15, %v716_v13  ;;  %v717_v19 = vpop.f32.mrf.mxu0  ;;  %v1767_v13 = vld [vmem:[#allocation10 + $0x50] sm:$0xff]  ;;  %v256_v15 = vld [vmem:[%s2101_s10] sm:$0x3] }
 0x1b3   :  { %v854_v16 = vperm.slane %v256_v15, 0 }
 0x1b4   :  { %1785 = vtanh.f32 %v729_v18  ;;  %1191 = vmatpush.bf16.msrb.mxu1 %v1767_v13 }
 0x1b9   :  { %v730_v21 = vpop.f32.mrf.mxu1 }
 0x1ba   :  { %v2072_v22 = vpop.eup %1785  ;;  %v855_v21 = vperm.slane %v256_v15, 1 }
 0x1bb   :  { %v733_v23 = vpack.c.bf16 %v2072_v22, %v2072_v22 }
 0x1bd   :  { %822 = vmatmul.bf16.vlgmr.msrb.gmra.mxu2 %v733_v23  ;;  %835 = vmatmul.bf16.vlgmr.msrb.gmra.mxu3 %v733_v23 }
 0x240   :  { %v823_v63 = vpop.f32.mrf.mxu2  ;;  %v836_v0 = vpop.f32.mrf.mxu3 }
 0x241   :  { %v840_v1 = vadd.f32 %v823_v63, %v2068_v25  ;;  %v841_v2 = vadd.f32 %v836_v0, %v2070_v26  ;;  %v1757_v25 = vld [vmem:[#allocation10] sm:$0xff]  ;;  %v1766_v26 = vld [vmem:[#allocation10 + $0x48] sm:$0xff] }
 0x242   :  { %1180 = vmatpush.bf16.msrb.mxu0 %v1757_v25  ;;  %1192 = vmatpush.bf16.msrb.mxu1 %v1766_v26 }
 0x243   :  { %v847_v3 = vadd.f32 %v843_v61, %v840_v1  ;;  %v848_v4 = vadd.f32 %v844_v62, %v841_v2 }
 0x245   :  { %v849_v5 = vmax.f32 %v847_v3, 0.0  ;;  %v850_v6 = vmax.f32 %v848_v4, 0.0 }
 0x246   :  { %1193 = vmatpush.bf16.msrb.mxu1 %v1765_v14 }
 0x247   :  { %v851_v7 = vpack.c.bf16 %v849_v5, %v849_v5  ;;  %v852_v8 = vpack.c.bf16 %v850_v6, %v850_v6 }
 0x248   :  { %v825_v9 = vpop.f32.mrf.mxu2  ;;  %v838_v10 = vpop.f32.mrf.mxu3 }
 0x249   :  { %1026 = vmatmul.bf16.vlgmr.msra.gmra.mxu0 %v851_v7  ;;  %1039 = vmatmul.bf16.vlgmr.msra.gmra.mxu1 %v852_v8 }
 0x24a   :  { %1052 = vmatmul.bf16.vlgmr.msra.gmra.mxu2 %v851_v7  ;;  %1065 = vmatmul.bf16.vlgmr.msra.gmra.mxu3 %v852_v8 }
 0x2c6   :  { %v1027_v17 = vpop.f32.mrf.mxu0  ;;  %v1040_v18 = vpop.f32.mrf.mxu1 }
 0x2c7   :  { %v1028_v19 = vadd.f32 %v1027_v17, %v854_v16 }
 0x2c9   :  { %v1041_v20 = vadd.f32 %v1040_v18, %v1028_v19 }
 0x2cb   :  { %v1070_v23 = vmax.f32 %v1041_v20, 0.0 }
 0x2cd   :  { %v1072_v24 = vpack.c.bf16 %v1070_v23, %v1070_v23  ;;  %v1053_v27 = vpop.f32.mrf.mxu2  ;;  %v1066_v28 = vpop.f32.mrf.mxu3 }
 0x2ce   :  { %v1054_v29 = vadd.f32 %v1053_v27, %v855_v21  ;;  %v1029_v30 = vpop.f32.mrf.mxu0  ;;  %v1042_v31 = vpop.f32.mrf.mxu1 }
 0x2cf   :  { %1181 = vmatmul.bf16.vlgmr.msrb.gmra.mxu0 %v1072_v24 }
 0x2d0   :  { %v1067_v32 = vadd.f32 %v1066_v28, %v1054_v29 }
 0x2d2   :  { %v1071_v33 = vmax.f32 %v1067_v32, 0.0 }
 0x2d4   :  { %v1073_v34 = vpack.c.bf16 %v1071_v33, %v1071_v33 }
 0x2d5   :  { %v1055_v35 = vpop.f32.mrf.mxu2  ;;  %v1068_v36 = vpop.f32.mrf.mxu3 }
 0x2d6   :  { %1194 = vmatmul.bf16.vlgmr.msrb.gmra.mxu1 %v1073_v34 }
 0x34c   :  { %v1182_v37 = vpop.f32.mrf.mxu0 }
 0x34d   :  { %v1183_v39 = vadd.f32 %v1784_v38, %v1182_v37 }
 0x353   :  { %v1195_v40 = vpop.f32.mrf.mxu1 }
 0x354   :  { %v1196_v41 = vadd.f32 %v1195_v40, %v1183_v39  ;;  %v1184_v42 = vpop.f32.mrf.mxu0 }
 0x356   :  { %v1199_v43 = vadd.f32 %v2072_v22, %v1196_v41 }
 0x358   :  { %1200 = vst [vmem:[%s2104_s13] sm:$0xff] %v1199_v43 }
 0x35b   :  { %v1197_v44 = vpop.f32.mrf.mxu1 }
 0x35c   :  { %1205 = vsyncpa [#allocation3], 1 }
 0x35d   :  { %1206 = vsyncpa [#allocation5], 1 }
 0x35e   :  { %1207 = vsyncpa [#allocation8], 1 }
 0x35f   :  { %1208 = vsyncpa [#allocation11], 1 }

</bundles_post_ra>
